<compile_context>
chip_gen: v5e
topology: v5e:2x2
jax: 0.10.0
libtpu: 0.0.40
codegen_flags: <defaults>
</compile_context>

<pallas_src>
import jax
import jax.numpy as jnp
from jax import lax
from jax.experimental import pallas as pl
from jax.experimental.pallas import tpu as pltpu


def class_embedding_kernel(c_ref, emb_ref, w1_ref, b1_ref, w2_ref, b2_ref, out_ref):
    # c_ref:   (B, 1)   int32  class indices (VMEM)
    # emb_ref: (K, CP)  f32    embedding table, feature dim zero-padded to CP
    # w1_ref:  (CP, CP) f32    lin1 weight, PyTorch [out, in] layout (zero-padded)
    # b1_ref:  (1, CP)  f32
    # w2_ref:  (CP, CP) f32    lin2 weight, PyTorch [out, in] layout (zero-padded)
    # b2_ref:  (1, CP)  f32
    # out_ref: (B, CP)  f32    lane-dense output slab
    K = emb_ref.shape[0]
    B = out_ref.shape[0]

    # --- MLP over the K-row embedding table (runs once; grid has a single step).
    # Contract the activations' last dim with the [out, in] weight's last dim,
    # i.e. x @ W.T, without any wrapper-side transpose.
    dn = (((1,), (1,)), ((), ()))
    h = lax.dot_general(emb_ref[...], w1_ref[...], dn,
                        preferred_element_type=jnp.float32) + b1_ref[...]
    h = h * jax.nn.sigmoid(h)                                   # Swish
    tbl = lax.dot_general(h, w2_ref[...], dn,
                          preferred_element_type=jnp.float32) + b2_ref[...]

    # --- Vectorized one-hot gather on the MXU: (B, K) @ (K, CP) -> (B, CP).
    idx = jnp.clip(c_ref[...], 0, K - 1)                        # (B, 1), clamp like jnp.take
    classes = lax.broadcasted_iota(jnp.int32, (B, K), 1)        # (B, K)
    one_hot = (classes == idx).astype(jnp.float32)              # (B, K)
    out_ref[...] = jnp.dot(one_hot, tbl, preferred_element_type=jnp.float32)


def class_embedding_forward(c, emb_table, w1, b1, w2, b2):
    """c: [B] integer class indices.  w1/w2: [out, in] (PyTorch nn.Linear layout)."""
    B = c.shape[0]
    K, C = emb_table.shape
    CP = pl.cdiv(C, 128) * 128          # lane-dense feature width
    pad = CP - C

    # Zero-padding the feature dims keeps the first C output columns exact
    # (padded inputs are 0, padded weight rows/cols are 0, Swish(0) = 0).
    f32 = jnp.float32
    embp = jnp.pad(emb_table.astype(f32), ((0, 0), (0, pad)))
    w1p = jnp.pad(w1.astype(f32), ((0, pad), (0, pad)))
    b1p = jnp.pad(b1.astype(f32).reshape(1, C), ((0, 0), (0, pad)))
    w2p = jnp.pad(w2.astype(f32), ((0, pad), (0, pad)))
    b2p = jnp.pad(b2.astype(f32).reshape(1, C), ((0, 0), (0, pad)))
    c2d = c.astype(jnp.int32).reshape(B, 1)

    resident = lambda i: (0, 0)          # every block is the full array; grid=(1,)

    out_padded = pl.pallas_call(
        class_embedding_kernel,
        out_shape=jax.ShapeDtypeStruct((B, CP), jnp.float32),
        grid_spec=pltpu.PrefetchScalarGridSpec(
            num_scalar_prefetch=0,
            grid=(1,),
            in_specs=[
                pl.BlockSpec((B, 1), resident),     # class indices
                pl.BlockSpec((K, CP), resident),    # embedding table
                pl.BlockSpec((CP, CP), resident),   # w1 [out, in]
                pl.BlockSpec((1, CP), resident),    # b1
                pl.BlockSpec((CP, CP), resident),   # w2 [out, in]
                pl.BlockSpec((1, CP), resident),    # b2
            ],
            out_specs=pl.BlockSpec((B, CP), resident),
        ),
        compiler_params=pltpu.CompilerParams(
            dimension_semantics=("arbitrary",),
        ),
    )(c2d, embp, w1p, b1p, w2p, b2p)

    return out_padded[:, :C]


def reference_forward(c, emb_table, w1, b1, w2, b2):
    emb = jnp.take(emb_table, c, axis=0)
    h = emb @ w1.T + b1
    h = h * jax.nn.sigmoid(h)
    return h @ w2.T + b2


if __name__ == "__main__":
    num_classes = 10
    n_channels = 16
    batch = 8

    key = jax.random.PRNGKey(0)
    k_emb, k_w1, k_b1, k_w2, k_b2, k_c = jax.random.split(key, 6)

    # Deterministic synthetic parameters (shapes match the PyTorch module).
    emb_table = jax.random.normal(k_emb, (num_classes, n_channels), jnp.float32)
    bound = 1.0 / (n_channels ** 0.5)
    w1 = jax.random.uniform(k_w1, (n_channels, n_channels), jnp.float32, -bound, bound)
    b1 = jax.random.uniform(k_b1, (n_channels,), jnp.float32, -bound, bound)
    w2 = jax.random.uniform(k_w2, (n_channels, n_channels), jnp.float32, -bound, bound)
    b2 = jax.random.uniform(k_b2, (n_channels,), jnp.float32, -bound, bound)

    # Example input: class indices.
    c = jax.random.randint(k_c, (batch,), 0, num_classes, jnp.int32)

    out = class_embedding_forward(c, emb_table, w1, b1, w2, b2)
    out = jax.block_until_ready(out)

    ref = reference_forward(c, emb_table, w1, b1, w2, b2)
    assert out.shape == (batch, n_channels)
    assert jnp.allclose(out, ref, atol=1e-5, rtol=1e-5), float(jnp.max(jnp.abs(out - ref)))

    print("KERNEL_OK")
</pallas_src>

<mosaic_0001>
module attributes {stable_mosaic.version = 11 : i64} {
  func.func @class_embedding_kernel(%arg0: i32, %arg1: memref<8x1xi32, #tpu.memory_space<vmem>>, %arg2: memref<10x128xf32, #tpu.memory_space<vmem>>, %arg3: memref<128x128xf32, #tpu.memory_space<vmem>>, %arg4: memref<1x128xf32, #tpu.memory_space<vmem>>, %arg5: memref<128x128xf32, #tpu.memory_space<vmem>>, %arg6: memref<1x128xf32, #tpu.memory_space<vmem>>, %arg7: memref<8x128xf32, #tpu.memory_space<vmem>>) attributes {dimension_semantics = [#tpu.dimension_semantics<arbitrary>], iteration_bounds = array<i64: 1>, scalar_prefetch = 0 : i64, scratch_operands = 0 : i64, tpu.core_type = #tpu.core_type<tc>, window_params = [{pipeline_mode = #tpu.pipeline_mode<synchronous>, transform_indices = @transform_0, window_bounds = array<i64: 8, 1>}, {pipeline_mode = #tpu.pipeline_mode<synchronous>, transform_indices = @transform_1, window_bounds = array<i64: 10, 128>}, {pipeline_mode = #tpu.pipeline_mode<synchronous>, transform_indices = @transform_2, window_bounds = array<i64: 128, 128>}, {pipeline_mode = #tpu.pipeline_mode<synchronous>, transform_indices = @transform_3, window_bounds = array<i64: 1, 128>}, {pipeline_mode = #tpu.pipeline_mode<synchronous>, transform_indices = @transform_4, window_bounds = array<i64: 128, 128>}, {pipeline_mode = #tpu.pipeline_mode<synchronous>, transform_indices = @transform_5, window_bounds = array<i64: 1, 128>}, {pipeline_mode = #tpu.pipeline_mode<synchronous>, transform_indices = @transform_6, window_bounds = array<i64: 8, 128>}]} {
    %c0 = arith.constant 0 : index
    %c0_0 = arith.constant 0 : index
    %0 = vector.load %arg2[%c0, %c0_0] : memref<10x128xf32, #tpu.memory_space<vmem>>, vector<10x128xf32>
    %c0_1 = arith.constant 0 : index
    %c0_2 = arith.constant 0 : index
    %1 = vector.load %arg3[%c0_1, %c0_2] : memref<128x128xf32, #tpu.memory_space<vmem>>, vector<128x128xf32>
    %cst = arith.constant dense<0.000000e+00> : vector<10x128xf32>
    %2 = tpu.matmul %0, %1, %cst {dimension_numbers = #tpu.dot_dimension_numbers<[1], [1], [0], [0], [0, 0, 1, 0], [], []>} : vector<10x128xf32>, vector<128x128xf32>, vector<10x128xf32> -> vector<10x128xf32>
    %c0_3 = arith.constant 0 : index
    %c0_4 = arith.constant 0 : index
    %3 = vector.load %arg4[%c0_3, %c0_4] : memref<1x128xf32, #tpu.memory_space<vmem>>, vector<1x128xf32>
    %4 = vector.broadcast %3 : vector<1x128xf32> to vector<10x128xf32>
    %5 = arith.addf %2, %4 : vector<10x128xf32>
    %6 = arith.negf %5 : vector<10x128xf32>
    %7 = math.exp %6 : vector<10x128xf32>
    %cst_5 = arith.constant 1.000000e+00 : f32
    %8 = vector.broadcast %cst_5 : f32 to vector<10x128xf32>
    %9 = arith.addf %8, %7 : vector<10x128xf32>
    %10 = arith.divf %8, %9 : vector<10x128xf32>
    %11 = arith.mulf %5, %10 : vector<10x128xf32>
    %c0_6 = arith.constant 0 : index
    %c0_7 = arith.constant 0 : index
    %12 = vector.load %arg5[%c0_6, %c0_7] : memref<128x128xf32, #tpu.memory_space<vmem>>, vector<128x128xf32>
    %cst_8 = arith.constant dense<0.000000e+00> : vector<10x128xf32>
    %13 = tpu.matmul %11, %12, %cst_8 {dimension_numbers = #tpu.dot_dimension_numbers<[1], [1], [0], [0], [0, 0, 1, 0], [], []>} : vector<10x128xf32>, vector<128x128xf32>, vector<10x128xf32> -> vector<10x128xf32>
    %c0_9 = arith.constant 0 : index
    %c0_10 = arith.constant 0 : index
    %14 = vector.load %arg6[%c0_9, %c0_10] : memref<1x128xf32, #tpu.memory_space<vmem>>, vector<1x128xf32>
    %15 = vector.broadcast %14 : vector<1x128xf32> to vector<10x128xf32>
    %16 = arith.addf %13, %15 : vector<10x128xf32>
    %c0_11 = arith.constant 0 : index
    %c0_12 = arith.constant 0 : index
    %17 = vector.load %arg1[%c0_11, %c0_12] : memref<8x1xi32, #tpu.memory_space<vmem>>, vector<8x1xi32>
    %c0_i32 = arith.constant 0 : i32
    %c9_i32 = arith.constant 9 : i32
    %18 = vector.broadcast %c0_i32 : i32 to vector<8x1xi32>
    %19 = arith.maxsi %18, %17 : vector<8x1xi32>
    %20 = vector.broadcast %c9_i32 : i32 to vector<8x1xi32>
    %21 = arith.minsi %20, %19 : vector<8x1xi32>
    %22 = tpu.iota {dimensions = array<i32: 1>} : vector<8x10xi32>
    %23 = vector.broadcast %21 : vector<8x1xi32> to vector<8x10xi32>
    %24 = arith.cmpi eq, %22, %23 : vector<8x10xi32>
    %25 = arith.extui %24 : vector<8x10xi1> to vector<8x10xi32>
    %26 = arith.sitofp %25 : vector<8x10xi32> to vector<8x10xf32>
    %cst_13 = arith.constant dense<0.000000e+00> : vector<8x128xf32>
    %27 = tpu.matmul %26, %16, %cst_13 {dimension_numbers = #tpu.dot_dimension_numbers<[1], [0], [0], [1], [0, 0, 1, 1], [], []>} : vector<8x10xf32>, vector<10x128xf32>, vector<8x128xf32> -> vector<8x128xf32>
    %c0_14 = arith.constant 0 : index
    %c0_15 = arith.constant 0 : index
    %28 = vector.load %arg7[%c0_14, %c0_15] : memref<8x128xf32, #tpu.memory_space<vmem>>, vector<8x128xf32>
    tpu.vector_store %arg7[%c0_14, %c0_15], %27 {strides = array<i32>} : memref<8x128xf32, #tpu.memory_space<vmem>>, vector<8x128xf32>,
    return
  }
  func.func @transform_0(%arg0: i32) -> (i32, i32) {
    %c0_i32 = arith.constant 0 : i32
    %c0_i32_0 = arith.constant 0 : i32
    %c0_i32_1 = arith.constant 0 : i32
    return %c0_i32, %c0_i32_0 : i32, i32
  }
  func.func @transform_1(%arg0: i32) -> (i32, i32) {
    %c0_i32 = arith.constant 0 : i32
    %c0_i32_0 = arith.constant 0 : i32
    %c0_i32_1 = arith.constant 0 : i32
    return %c0_i32, %c0_i32_0 : i32, i32
  }
  func.func @transform_2(%arg0: i32) -> (i32, i32) {
    %c0_i32 = arith.constant 0 : i32
    %c0_i32_0 = arith.constant 0 : i32
    %c0_i32_1 = arith.constant 0 : i32
    return %c0_i32, %c0_i32_0 : i32, i32
  }
  func.func @transform_3(%arg0: i32) -> (i32, i32) {
    %c0_i32 = arith.constant 0 : i32
    %c0_i32_0 = arith.constant 0 : i32
    %c0_i32_1 = arith.constant 0 : i32
    return %c0_i32, %c0_i32_0 : i32, i32
  }
  func.func @transform_4(%arg0: i32) -> (i32, i32) {
    %c0_i32 = arith.constant 0 : i32
    %c0_i32_0 = arith.constant 0 : i32
    %c0_i32_1 = arith.constant 0 : i32
    return %c0_i32, %c0_i32_0 : i32, i32
  }
  func.func @transform_5(%arg0: i32) -> (i32, i32) {
    %c0_i32 = arith.constant 0 : i32
    %c0_i32_0 = arith.constant 0 : i32
    %c0_i32_1 = arith.constant 0 : i32
    return %c0_i32, %c0_i32_0 : i32, i32
  }
  func.func @transform_6(%arg0: i32) -> (i32, i32) {
    %c0_i32 = arith.constant 0 : i32
    %c0_i32_0 = arith.constant 0 : i32
    %c0_i32_1 = arith.constant 0 : i32
    return %c0_i32, %c0_i32_0 : i32, i32
  }
}

</mosaic_0001>

<bundles_post_ra>
// kernel: tpu_custom_call.1
= control target key start
LH: loop header
LB: loop body
LE: loop exit
PB: predicated region body
PF: predicated region fallthrough
CT: control target
= control target key end

     0   :  { %11 = vsyncpa [#allocation3], 0  ;;  %s465_s0 = inlined_call_operand.vmem [shape: s32[8,1], index: 0, kind: input, shape index: {}]   ;;  %s466_s1 = inlined_call_operand.hbm [shape: f32[10,128], index: 1, kind: input, shape index: {}]   ;;  %s467_s2 = inlined_call_operand.hbm [shape: f32[128,128], index: 2, kind: input, shape index: {}]   ;;  %s468_s3 = inlined_call_operand.vmem [shape: f32[1,128], index: 3, kind: input, shape index: {}]   ;;  %s469_s4 = inlined_call_operand.hbm [shape: f32[128,128], index: 4, kind: input, shape index: {}]   ;;  %s470_s5 = inlined_call_operand.vmem [shape: f32[1,128], index: 5, kind: input, shape index: {}]   ;;  %s471_s6 = inlined_call_operand.hbm [shape: f32[8,128], index: 6, kind: output, shape index: {}]  }
   0x1   :  { %12 = vsyncpa [#allocation6], 0 }
   0x2   :  { %13 = vsyncpa [#allocation4], 0  ;;  %s33_s23 = sshll.u32 %s467_s2, 4  ;;  %s401_s24 = smov [#allocation5]   ;;  %s34_s23 = int_to_ptr.hbm [resolvable:$true] %s33_s23 }
   0x3   :  { %s35_s25 = sshll.u32 %s401_s24, 4  ;;  %s20_s28 = sshll.u32 %s466_s1, 4  ;;  %s36_s25 = int_to_ptr.vmem [resolvable:$true] %s35_s25  ;;  %s21_s28 = int_to_ptr.hbm [resolvable:$true] %s20_s28 }
   0x4   :  { %s402_s29 = smov 128   ;;  %s403_s30 = smov 8  }
   0x5   :  { %41 = dma.hbm_to_vmem [thread:$0]  %s34_s23, 2048, %s36_s25, [#allocation6], %s402_s29, %s402_s29, %s403_s30  }
   0x6   :  { %s404_s7 = smov [#allocation2]   ;;  %s48_s11 = sshll.u32 %s469_s4, 4  ;;  %s49_s11 = int_to_ptr.hbm [resolvable:$true] %s48_s11 }
   0x7   :  { %s22_s8 = sshll.u32 %s404_s7, 4  ;;  %s405_s2 = smov [#allocation7]   ;;  %s23_s8 = int_to_ptr.vmem [resolvable:$true] %s22_s8 }
   0x8   :  { %28 = dma.hbm_to_vmem [thread:$0]  %s21_s28, 256, %s23_s8, [#allocation3], %s402_s29, %s402_s29, %s403_s30  }
   0x9   :  { %s50_s12 = sshll.u32 %s405_s2, 4  ;;  %s51_s12 = int_to_ptr.vmem [resolvable:$true] %s50_s12 }
   0xa   :  { %56 = dma.hbm_to_vmem [thread:$0]  %s49_s11, 2048, %s51_s12, [#allocation6], %s402_s29, %s402_s29, %s403_s30  }
   0xb   :  { %395 = dma.done.wait [#allocation3], 256  }
   0xc   :  { %396 = vsyncadd [#allocation3], 4294967040 }
   0xd   :  { %397 = dma.done.wait [#allocation6], 4096  }
   0xe   :  { %398 = vsyncadd [#allocation6], 4294963200  ;;  %v88_v0 = vld [vmem:[#allocation5 + $0x78] sm:$0xff]  ;;  %v87_v1 = vld [vmem:[#allocation5 + $0x70] sm:$0xff]  ;;  %v406_v42 = vmov 0   ;;  %vm216_vm11 = vcmask 1041408  }
   0xf   :  { %93 = vmatpush.xpose.msra.mxu0 %v88_v0  ;;  %264 = vmatpush.xpose.msra.mxu3 %v88_v0  ;;  %v86_v2 = vld [vmem:[#allocation5 + $0x68] sm:$0xff]  ;;  %v85_v3 = vld [vmem:[#allocation5 + $0x60] sm:$0xff]  ;;  %v84_v4 = vld [vmem:[#allocation5 + $0x58] sm:$0xff]  ;;  %vm212_vm12 = vcmask 80896   ;;  %s408_s15 = smov [#allocation8]   ;;  %s248_s19 = sshll.u32 %s471_s6, 4  ;;  %s249_s19 = int_to_ptr.hbm [resolvable:$true] %s248_s19 }
  0x10   :  { %v83_v5 = vld [vmem:[#allocation5 + $0x50] sm:$0xff]  ;;  %v82_v6 = vld [vmem:[#allocation5 + $0x48] sm:$0xff]  ;;  %v81_v7 = vld [vmem:[#allocation5 + $0x40] sm:$0xff]  ;;  %288 = vset.pattern.permute.xlu0 %v406_v42  ;;  %s246_s16 = sshll.u32 %s408_s15, 4  ;;  %s247_s16 = int_to_ptr.vmem [resolvable:$true] %s246_s16 }
  0x11   :  { %v80_v8 = vld [vmem:[#allocation5 + $0x38] sm:$0xff]  ;;  %v79_v10 = vld [vmem:[#allocation5 + $0x30] sm:$0xff]  ;;  %v78_v12 = vld [vmem:[#allocation5 + $0x28] sm:$0xff] }
  0x12   :  { %v171_v9 = vld [vmem:[#allocation7 + $0x78] sm:$0xff]  ;;  %v170_v11 = vld [vmem:[#allocation7 + $0x70] sm:$0xff]  ;;  %v169_v13 = vld [vmem:[#allocation7 + $0x68] sm:$0xff] }
  0x13   :  { %94 = vmatpush.xpose.msra.mxu0 %v87_v1  ;;  %265 = vmatpush.xpose.msra.mxu3 %v87_v1  ;;  %v77_v14 = vld [vmem:[#allocation5 + $0x20] sm:$0xff]  ;;  %v76_v16 = vld [vmem:[#allocation5 + $0x18] sm:$0xff]  ;;  %v75_v18 = vld [vmem:[#allocation5 + $0x10] sm:$0xff] }
  0x14   :  { %176 = vmatpush.xpose.msra.mxu1 %v171_v9  ;;  %v168_v15 = vld [vmem:[#allocation7 + $0x60] sm:$0xff]  ;;  %v167_v17 = vld [vmem:[#allocation7 + $0x58] sm:$0xff]  ;;  %v166_v19 = vld [vmem:[#allocation7 + $0x50] sm:$0xff] }
  0x15   :  { %v74_v20 = vld [vmem:[#allocation5 + $0x8] sm:$0xff]  ;;  %v73_v22 = vld [vmem:[#allocation5] sm:$0xff]  ;;  %v71_v24 = vld [vmem:[#allocation2] sm:$0xff] }
  0x16   :  { %v165_v21 = vld [vmem:[#allocation7 + $0x48] sm:$0xff]  ;;  %v164_v23 = vld [vmem:[#allocation7 + $0x40] sm:$0xff]  ;;  %v72_v25 = vld [vmem:[#allocation2 + $0x8] sm:$0x3] }
  0x17   :  { %95 = vmatpush.xpose.msra.mxu0 %v86_v2  ;;  %266 = vmatpush.xpose.msra.mxu3 %v86_v2  ;;  %v163_v26 = vld [vmem:[#allocation7 + $0x38] sm:$0xff]  ;;  %v162_v27 = vld [vmem:[#allocation7 + $0x30] sm:$0xff]  ;;  %v161_v28 = vld [vmem:[#allocation7 + $0x28] sm:$0xff] }
  0x18   :  { %177 = vmatpush.xpose.msra.mxu1 %v170_v11  ;;  %v160_v29 = vld [vmem:[#allocation7 + $0x20] sm:$0xff]  ;;  %v159_v30 = vld [vmem:[#allocation7 + $0x18] sm:$0xff]  ;;  %v158_v31 = vld [vmem:[#allocation7 + $0x10] sm:$0xff] }
  0x19   :  { %v157_v32 = vld [vmem:[#allocation7 + $0x8] sm:$0xff]  ;;  %v156_v33 = vld [vmem:[#allocation7] sm:$0xff]  ;;  %v289_v34 = vld [vmem:[%s468_s3] ss:$0 sm:$0xff] }
  0x1a   :  { %v199_v41 = vld [vmem:[%s465_s0] sm:$0xff] }
  0x1b   :  { %96 = vmatpush.xpose.msra.mxu0 %v85_v3  ;;  %267 = vmatpush.xpose.msra.mxu3 %v85_v3  ;;  %vm200_vm0 = vcmp.gt.s32.totalorder %v199_v41, 0  ;;  %v290_v11 = vld [vmem:[%s470_s5] ss:$0 sm:$0xff] }
  0x1c   :  { %178 = vmatpush.xpose.msra.mxu1 %v169_v13  ;;  %v201_v44 = vsel %vm200_vm0, %v199_v41, 0 }
  0x1d   :  { %vm202_vm1 = vcmp.lt.s32.totalorder %v201_v44, 9 }
  0x1e   :  { %v203_v46 = vsel %vm202_vm1, %v201_v44, 9 }
  0x1f   :  { %97 = vmatpush.xpose.msra.mxu0 %v84_v4  ;;  %268 = vmatpush.xpose.msra.mxu3 %v84_v4 }
  0x20   :  { %179 = vmatpush.xpose.msra.mxu1 %v168_v15  ;;  %207 = vperm.xlu0 %288, %v203_v46   ;;  %v407_v15 = vmov 0.0  }
  0x23   :  { %98 = vmatpush.xpose.msra.mxu0 %v83_v5  ;;  %269 = vmatpush.xpose.msra.mxu3 %v83_v5 }
  0x24   :  { %180 = vmatpush.xpose.msra.mxu1 %v167_v17 }
  0x27   :  { %99 = vmatpush.xpose.msra.mxu0 %v82_v6  ;;  %270 = vmatpush.xpose.msra.mxu3 %v82_v6 }
  0x28   :  { %181 = vmatpush.xpose.msra.mxu1 %v166_v19 }
  0x2b   :  { %100 = vmatpush.xpose.msra.mxu0 %v81_v7  ;;  %271 = vmatpush.xpose.msra.mxu3 %v81_v7 }
  0x2c   :  { %182 = vmatpush.xpose.msra.mxu1 %v165_v21 }
  0x2f   :  { %101 = vmatpush.xpose.msra.mxu0 %v80_v8  ;;  %272 = vmatpush.xpose.msra.mxu3 %v80_v8  ;;  %v204_v8 = vlaneseq }
  0x30   :  { %183 = vmatpush.xpose.msra.mxu1 %v164_v23 }
  0x31   :  { %v205_v9 = vand.u32 127, %v204_v8 }
  0x33   :  { %102 = vmatpush.xpose.msra.mxu0 %v79_v10  ;;  %273 = vmatpush.xpose.msra.mxu3 %v79_v10 }
  0x34   :  { %184 = vmatpush.xpose.msra.mxu1 %v163_v26 }
  0x37   :  { %103 = vmatpush.xpose.msra.mxu0 %v78_v12  ;;  %274 = vmatpush.xpose.msra.mxu3 %v78_v12 }
  0x38   :  { %185 = vmatpush.xpose.msra.mxu1 %v162_v27 }
  0x3b   :  { %104 = vmatpush.xpose.msra.mxu0 %v77_v14  ;;  %275 = vmatpush.xpose.msra.mxu3 %v77_v14 }
  0x3c   :  { %186 = vmatpush.xpose.msra.mxu1 %v161_v28 }
  0x3f   :  { %105 = vmatpush.xpose.msra.mxu0 %v76_v16  ;;  %276 = vmatpush.xpose.msra.mxu3 %v76_v16 }
  0x40   :  { %187 = vmatpush.xpose.msra.mxu1 %v160_v29 }
  0x43   :  { %106 = vmatpush.xpose.msra.mxu0 %v75_v18  ;;  %277 = vmatpush.xpose.msra.mxu3 %v75_v18 }
  0x44   :  { %188 = vmatpush.xpose.msra.mxu1 %v159_v30 }
  0x47   :  { %107 = vmatpush.xpose.msra.mxu0 %v74_v20  ;;  %278 = vmatpush.xpose.msra.mxu3 %v74_v20 }
  0x48   :  { %189 = vmatpush.xpose.msra.mxu1 %v158_v31 }
  0x4b   :  { %108 = vmatpush.xpose.msra.mxu0 %v73_v22  ;;  %279 = vmatpush.xpose.msra.mxu3 %v73_v22 }
  0x4c   :  { %190 = vmatpush.xpose.msra.mxu1 %v157_v32 }
  0x4e   :  { %109 = vmatmul.f32.vlgmr.msra.gmra.mxu0 %v71_v24  ;;  %112 = vmatmul.f32.vlgmr.msra.gmra.mxu3 %v72_v25 }
  0x50   :  { %191 = vmatpush.xpose.msra.mxu1 %v156_v33 }
  0x92   :  { %v208_v10 = vpop.permute.xlu0 %207 }
  0x93   :  { %vm209_vm10 = vcmp.eq.s32.totalorder %v205_v9, %v208_v10 }
  0x94   :  { %v261_v16 = vsel %vm209_vm10, 1.0, %v407_v15 }
  0xcb   :  { %v110_v35 = vpop.f32.mrf.mxu0 }
  0xcc   :  { %v111_v36 = vadd.f32 %v289_v34, %v110_v35 }
  0xce   :  { %v259_v37 = vmul.f32 -1.442695, %v111_v36 }
  0xd0   :  { %291 = vpow2.f32 %v259_v37 }
  0xd1   :  { %v113_v38 = vpop.f32.mrf.mxu3 }
  0xd2   :  { %v114_v39 = vadd.f32 %v289_v34, %v113_v38 }
  0xd4   :  { %v260_v40 = vmul.f32 -1.442695, %v114_v39 }
  0xd6   :  { %v292_v43 = vpop.eup %291  ;;  %293 = vpow2.f32 %v260_v40 }
  0xd7   :  { %v122_v45 = vadd.f32 1.0, %v292_v43 }
  0xd9   :  { %295 = vrcp.f32 %v122_v45  ;;  %v135_v52 = vand.u32 2147483648, %v122_v45  ;;  %v133_v54 = vand.u32 2147483647, %v122_v45  ;;  %vm129_vm3 = vweird.f32 %v122_v45 }
  0xdb   :  { %v136_v58 = vor.u32 1.1754944e-38, %v135_v52  ;;  %vm134_vm5 = vcmp.eq.f32.partialorder %v133_v54, 8.507059e+37 }
  0xdc   :  { %v294_v47 = vpop.eup %293 }
  0xdd   :  { %v123_v48 = vadd.f32 1.0, %v294_v47 }
  0xdf   :  { %v296_v49 = vpop.eup %295  ;;  %297 = vrcp.f32 %v123_v48  ;;  %v150_v62 = vand.u32 2147483648, %v123_v48  ;;  %v148_v1 = vand.u32 2147483647, %v123_v48  ;;  %vm144_vm7 = vweird.f32 %v123_v48 }
  0xe0   :  { %v125_v50 = vmul.f32 %v296_v49, %v122_v45  ;;  %vm130_vm2 = vweird.f32 %v296_v49 }
  0xe1   :  { %vm131_vm4 = vmor %vm129_vm3, %vm130_vm2  ;;  %v151_v3 = vor.u32 1.1754944e-38, %v150_v62  ;;  %vm149_vm9 = vcmp.eq.f32.partialorder %v148_v1, 8.507059e+37 }
  0xe2   :  { %v126_v51 = vsub.f32 1.0, %v125_v50 }
  0xe4   :  { %v127_v53 = vmul.f32 %v296_v49, %v126_v51 }
  0xe5   :  { %v298_v55 = vpop.eup %297 }
  0xe6   :  { %v128_v56 = vadd.f32 %v296_v49, %v127_v53  ;;  %v140_v57 = vmul.f32 %v298_v55, %v123_v48  ;;  %vm145_vm6 = vweird.f32 %v298_v55 }
  0xe7   :  { %vm146_vm8 = vmor %vm144_vm7, %vm145_vm6 }
  0xe8   :  { %v132_v59 = vsel %vm131_vm4, %v296_v49, %v128_v56  ;;  %v141_v60 = vsub.f32 1.0, %v140_v57 }
  0xe9   :  { %v137_v61 = vsel %vm134_vm5, %v136_v58, %v132_v59 }
  0xea   :  { %v154_v63 = vmul.f32 %v137_v61, %v111_v36  ;;  %v142_v0 = vmul.f32 %v298_v55, %v141_v60 }
  0xec   :  { %192 = vmatmul.f32.vlgmr.msra.gmra.mxu1 %v154_v63  ;;  %v143_v2 = vadd.f32 %v298_v55, %v142_v0 }
  0xee   :  { %v147_v4 = vsel %vm146_vm8, %v298_v55, %v143_v2 }
  0xef   :  { %v152_v5 = vsel %vm149_vm9, %v151_v3, %v147_v4 }
  0xf0   :  { %v155_v6 = vmul.f32 %v152_v5, %v114_v39 }
  0xf4   :  { %195 = vmatmul.f32.gmra.mxu1 %v155_v6 }
 0x169   :  { %v193_v7 = vpop.f32.mrf.mxu1 }
 0x16a   :  { %v194_v14 = vadd.f32 %v290_v11, %v193_v7 }
 0x171   :  { %v196_v12 = vpop.f32.mrf.mxu1 }
 0x172   :  { %v197_v13 = vadd.f32 %v290_v11, %v196_v12 }
 0x174   :  { %262 = vmatpush.msk.msra.mxu2 %vm216_vm11, %v197_v13 }
 0x176   :  { %235 = vmatpush.msra.mxu2 %v194_v14 }
 0x177   :  { %263 = vmatmul.msk.f32.vlgmr.msra.gmra.mxu2 %vm212_vm12, %v261_v16 }
 0x1fa   :  { %v237_v17 = vpop.f32.mrf.mxu2 }
 0x1fb   :  { %240 = vst [vmem:[#allocation8] sm:$0xff] %v237_v17 }
 0x1fc   :  { %251 = dma.vmem_to_hbm [thread:$0]  %s247_s16, 128, %s249_s19, [#allocation4]  }
 0x1fd   :  { %399 = dma.done.wait [#allocation4], 128  }
 0x1fe   :  { %400 = vsyncadd [#allocation4], 4294967168 }
 0x1ff   :  { %256 = vsyncpa [#allocation3], 1 }
 0x200   :  { %257 = vsyncpa [#allocation6], 1 }
 0x201   :  { %258 = vsyncpa [#allocation4], 1 }

</bundles_post_ra>
